<compile_context>
chip_gen: v6e
topology: v6e:2x2x1
jax: 0.10.0
libtpu: 0.0.40
codegen_flags: <defaults>
</compile_context>

<pallas_src>
import functools

import jax
import jax.numpy as jnp
from jax.experimental import pallas as pl
from jax.experimental.pallas import tpu as pltpu

_LANE = 128
# Widest-first candidate lane widths (all multiples of 128 => unmasked stores).
_WIDE_COLS = (8192, 4096, 2048, 1024, 512, 256, 128)


def _sublane_pack(dtype) -> int:
    """Sublane multiple for a dtype: 8 (32-bit), 16 (16-bit), 32 (8-bit)."""
    itemsize = jnp.dtype(dtype).itemsize
    return max(8, 32 // max(1, itemsize))


def _round_up(a: int, b: int) -> int:
    return ((a + b - 1) // b) * b


def _num_tensorcores() -> int:
    """Best-effort local TensorCore count (1 on v5e/v6e, 2 on v7x)."""
    try:
        info = pltpu.get_tpu_info()
        for name in ("num_cores", "core_count", "tensorcore_count", "num_tensorcores"):
            v = getattr(info, name, None)
            if isinstance(v, int) and v > 0:
                return v
    except Exception:
        pass
    try:
        kind = jax.devices()[0].device_kind.lower()
        if "7" in kind:          # v7x presents its 2 TensorCores behind one device
            return 2
    except Exception:
        pass
    return 1                     # v5e / v6e: forcing a split would be pure overhead


def _vmem_and_tile_budget():
    """(tile_bytes, vmem_limit_bytes) derived from physical VMEM of the chip."""
    cap = 64 * 1024 * 1024       # conservative default == v7x physical VMEM
    try:
        v = getattr(pltpu.get_tpu_info(), "vmem_capacity_bytes", None)
        if isinstance(v, int) and v > 0:
            cap = v
    except Exception:
        pass
    if cap >= 96 * 1024 * 1024:
        # v5e / v6e: 128 MiB physical -> larger tiles & scoped limit are free.
        return 8 * 1024 * 1024, 64 * 1024 * 1024
    # v7x: 64 MiB physical -> ~4 MiB tiles, headroom for lambda temporaries.
    return 4 * 1024 * 1024, 32 * 1024 * 1024


def _pick_cols(total: int, pack: int) -> int:
    """Lane width for the 2-D view of `total` elements (0 if none usable)."""
    # 1) Widest 128-multiple width dividing `total` that still leaves >= `pack`
    #    rows (fully packed sublanes AND fully unmasked stores).
    divs = [c for c in _WIDE_COLS if total % c == 0]
    for c in divs:
        if total // c >= pack:
            return c
    if divs:
        return divs[-1]          # tiny arrays: narrowest => densest sublane fill
    # 2) Non-128-divisible totals: any divisor in [128, 8192].  cols equals the
    #    full last dim, so the BlockSpec is legal; only the final partial
    #    lane-tile is masked and there are NO extra HBM pad/unpad passes.
    best_any = best_packed = 0
    for d in range(_LANE, min(_WIDE_COLS[0], total) + 1):
        if total % d == 0:
            best_any = d
            if total // d >= pack:
                best_packed = d
    return best_packed or best_any


def _pick_block_rows(rows, cols, pack, bytes_per_elem, tile_bytes, num_tc):
    """Rows per block: big tiles, pack-aligned, balanced across TensorCores."""
    if rows <= pack:
        return rows                                    # single full-extent block
    lane_cols = _round_up(cols, _LANE)                 # physical (lane-padded) width
    fit = max(pack, (tile_bytes // (lane_cols * bytes_per_elem)) // pack * pack)
    if fit >= rows:
        block_rows = rows                              # whole array in one block
        if num_tc > 1 and rows >= num_tc * pack:       # give both v7x TCs work
            block_rows = min(rows, _round_up(pl.cdiv(rows, num_tc), pack))
        return block_rows
    block_rows = fit
    grid_n = pl.cdiv(rows, block_rows)
    # v7x load balance: for small grids make the step count a multiple of the
    # TensorCore count (an odd 3-step grid leaves a 2:1 imbalance).
    if num_tc > 1 and grid_n <= 16 and grid_n % num_tc != 0:
        for tgt in range(_round_up(grid_n, num_tc), grid_n + 4 * num_tc, num_tc):
            cand = _round_up(pl.cdiv(rows, tgt), pack)
            if pack <= cand <= fit and pl.cdiv(rows, cand) % num_tc == 0:
                block_rows = cand
                break
    return block_rows


def _make_lambda_kernel(fn, param_dtypes):
    """Kernel applying `fn` to the current VMEM tile.

    Ref layout: (param_smem_refs..., x_ref, o_ref).  Scalar params ride through
    SMEM as 32-bit words (no closure capture of traced values -> no recompile
    when values change); their logical dtype is restored here.
    """
    n = len(param_dtypes)

    def kernel(*refs):
        p_refs = refs[:n]
        x_ref = refs[n]
        o_ref = refs[n + 1]
        pvals = [r[0].astype(dt) for r, dt in zip(p_refs, param_dtypes)]
        x = x_ref[...]
        y = fn(x, *pvals) if n else fn(x)
        o_ref[...] = y.astype(o_ref.dtype)

    return kernel


def _launch_2d(fn, x2d, smem_params, param_dtypes, out_dtype, pack,
               tile_bytes, vmem_limit, num_tc, cost):
    rows, cols = x2d.shape
    bytes_per_elem = max(4, jnp.dtype(x2d.dtype).itemsize,
                         jnp.dtype(out_dtype).itemsize)   # 4: f32 temporaries
    block_rows = _pick_block_rows(rows, cols, pack, bytes_per_elem,
                                  tile_bytes, num_tc)
    grid = (pl.cdiv(rows, block_rows),)
    n = len(smem_params)
    in_specs = ([pl.BlockSpec(memory_space=pltpu.MemorySpace.SMEM)] * n
                + [pl.BlockSpec((block_rows, cols), lambda i: (i, 0))])
    return pl.pallas_call(
        _make_lambda_kernel(fn, param_dtypes),
        out_shape=jax.ShapeDtypeStruct((rows, cols), out_dtype),
        grid_spec=pl.GridSpec(
            grid=grid,
            in_specs=in_specs,
            out_specs=pl.BlockSpec((block_rows, cols), lambda i: (i, 0)),
        ),
        compiler_params=pltpu.CompilerParams(
            dimension_semantics=("parallel",),
            vmem_limit_bytes=vmem_limit,
        ),
        cost_estimate=cost,
    )(*smem_params, x2d)


def _plain(fn, x, params):
    """Plain-JAX fallback for lambdas the generic elementwise kernel can't host."""
    return fn(x, *params) if params else fn(x)


@functools.partial(jax.jit, static_argnums=(0,))
def _pallas_apply_elementwise(fn, x, params):
    orig_shape, in_dtype, total = x.shape, x.dtype, x.size

    def call_fn(a, *ps):
        return fn(a, *ps) if ps else fn(a)

    p_scalar_specs = tuple(jax.ShapeDtypeStruct((), p.dtype) for p in params)
    out_abs = jax.eval_shape(call_fn, jax.ShapeDtypeStruct(orig_shape, in_dtype),
                             *p_scalar_specs)

    def _ok_dtype(dt):
        return (jnp.issubdtype(dt, jnp.floating) or jnp.issubdtype(dt, jnp.integer)
                or jnp.issubdtype(dt, jnp.bool_))

    elementwise = (isinstance(out_abs, jax.ShapeDtypeStruct)
                   and out_abs.shape == orig_shape
                   and _ok_dtype(in_dtype) and _ok_dtype(out_abs.dtype)
                   and all(p.size == 1 and _ok_dtype(p.dtype) for p in params))

    if not elementwise or total < _LANE:
        # TODO(synk): non-elementwise lambdas (reductions, softmax over a dim,
        # reshapes, pytree outputs) have no generic tile-local lowering; run
        # them as plain JAX.  Sub-128-element inputs aren't worth a launch.
        return _plain(fn, x, params)

    out_dtype = out_abs.dtype
    pack = max(_sublane_pack(in_dtype), _sublane_pack(out_dtype))
    tile_bytes, vmem_limit = _vmem_and_tile_budget()
    num_tc = _num_tensorcores()

    param_dtypes = tuple(p.dtype for p in params)
    smem_params = tuple(
        jnp.reshape(p, (1,)).astype(
            jnp.float32 if jnp.issubdtype(p.dtype, jnp.floating) else jnp.int32)
        for p in params)

    # Advisory cost for XLA scheduling, derived from the actual lambda when
    # possible (a pure-VPU lambda shouldn't claim `total` transcendentals).
    try:
        cost = pl.estimate_cost(call_fn, jax.ShapeDtypeStruct(orig_shape, in_dtype),
                                *p_scalar_specs)
    except Exception:
        cost = pl.CostEstimate(
            flops=2 * total, transcendentals=0,
            bytes_accessed=total * (jnp.dtype(in_dtype).itemsize
                                    + jnp.dtype(out_dtype).itemsize))

    flat = jnp.reshape(x, (total,))
    cols = _pick_cols(total, pack)

    if cols:
        # Zero-copy path: the (rows, cols) reshape is free, no HBM pad/unpad,
        # and no padded values ever flow through the user lambda.
        out2d = _launch_2d(fn, jnp.reshape(flat, (total // cols, cols)),
                           smem_params, param_dtypes, out_dtype, pack,
                           tile_bytes, vmem_limit, num_tc, cost)
        return jnp.reshape(out2d, orig_shape)

    # Degenerate sizes (no divisor of `total` in [128, 8192], e.g. primes):
    # kernel on the 128-aligned prefix, plain jnp on the < 128-element tail.
    # TODO(synk): a fully copy-free ragged path would need a manual-DMA kernel
    # over the flat HBM buffer (memory_space=pl.ANY).
    aligned = (total // _LANE) * _LANE
    cols_h = _pick_cols(aligned, pack)
    head2d = jnp.reshape(flat[:aligned], (aligned // cols_h, cols_h))
    head = jnp.reshape(
        _launch_2d(fn, head2d, smem_params, param_dtypes, out_dtype, pack,
                   tile_bytes, vmem_limit, num_tc, cost),
        (aligned,))
    tail = _plain(fn, flat[aligned:], tuple(jnp.reshape(p, ()) for p in params))
    return jnp.reshape(jnp.concatenate([head, tail.astype(out_dtype)]), orig_shape)


class Lambda:
    """JAX/Pallas port of qelos_core.basic.Lambda.

    Stores a callable `lamda` plus optional registered parameters / sub-modules
    and applies `lamda` in `__call__` (== torch forward).  Elementwise lambdas
    run inside a Pallas TPU kernel tiled over lane-dense VMEM blocks.  Because
    a Pallas kernel may not capture traced constants, registered scalar
    parameters are passed to the lambda explicitly (routed via SMEM), i.e. the
    lambda's signature is `lamda(x, *reg_params)` when reg_params is given.

    Notes:
      * Scalar floating reg-params are cast to x.dtype so the kernel's output
        dtype matches the input dtype (keeps HBM writeback minimal for bf16).
      * On v5e (no bf16 EUP/VPU) transcendental-heavy lambdas (tanh/exp) may be
        EUP-bound; prefer EUP-friendly forms such as pl.reciprocal(approx=True)
        or rsqrt inside the lambda if that regime is hit.
    """

    def __init__(self, lamda, reg_params=None, reg_modules=None):
        self.lamda = lamda
        self._reg_params = tuple(reg_params) if reg_params is not None else ()
        self._reg_modules = tuple(reg_modules) if reg_modules is not None else ()
        # TODO(synk): reg_params / reg_modules only affect parameter
        # registration (optimizer visibility) in PyTorch; they carry no
        # forward-pass compute beyond what `lamda` itself does.

    def __call__(self, x):
        x = jnp.asarray(x)
        params = []
        for p in self._reg_params:
            p = jnp.asarray(p)
            # Keep out_dtype == in_dtype for the mem-bound writeback: scalar
            # floating params follow x.dtype instead of promoting it.
            if (p.size == 1 and jnp.issubdtype(p.dtype, jnp.floating)
                    and jnp.issubdtype(x.dtype, jnp.floating)
                    and p.dtype != x.dtype):
                p = p.astype(x.dtype)
            params.append(p)
        return _pallas_apply_elementwise(self.lamda, x, tuple(params))


if __name__ == "__main__":
    key = jax.random.PRNGKey(0)

    # --- Test 1: lambda with registered scalar params (SMEM-routed) ----------
    alpha = jnp.float32(2.0)
    beta = jnp.float32(0.5)
    lamda = lambda x, alpha, beta: jnp.tanh(x) * alpha + beta
    module = Lambda(lamda, reg_params=[alpha, beta])

    x = jax.random.normal(key, (2, 4, 16, 16), dtype=jnp.float32)  # 2048 elems
    y = jax.block_until_ready(module(x))
    y_ref = jnp.tanh(x) * alpha + beta
    assert y.shape == x.shape and y.dtype == x.dtype
    assert jnp.allclose(y, y_ref, atol=1e-6, rtol=1e-6)

    # --- Test 2: param-free lambda on a non-128-divisible size ---------------
    # total = 1800 -> divisor-based lane width (no HBM pad/unpad passes).
    relu = Lambda(lambda x: jnp.maximum(x, 0.0))
    x2 = jax.random.normal(jax.random.PRNGKey(1), (2, 4, 15, 15), dtype=jnp.float32)
    y2 = jax.block_until_ready(relu(x2))
    assert y2.shape == x2.shape and y2.dtype == x2.dtype
    assert jnp.allclose(y2, jnp.maximum(x2, 0.0), atol=0.0, rtol=0.0)

    print("KERNEL_OK")
</pallas_src>

<mosaic_0001>
module attributes {stable_mosaic.version = 11 : i64} {
  func.func @kernel(%arg0: i32, %arg1: memref<1xf32, #tpu.memory_space<smem>>, %arg2: memref<1xf32, #tpu.memory_space<smem>>, %arg3: memref<8x256xf32, #tpu.memory_space<vmem>>, %arg4: memref<8x256xf32, #tpu.memory_space<vmem>>) attributes {dimension_semantics = [#tpu.dimension_semantics<parallel>], iteration_bounds = array<i64: 1>, scalar_prefetch = 0 : i64, scratch_operands = 0 : i64, tpu.core_type = #tpu.core_type<tc>, window_params = [{transform_indices = @transform_0, window_bounds = array<i64: 1>}, {transform_indices = @transform_1, window_bounds = array<i64: 1>}, {transform_indices = @transform_2, window_bounds = array<i64: 8, 256>}, {transform_indices = @transform_3, window_bounds = array<i64: 8, 256>}]} {
    %c0 = arith.constant 0 : index
    %0 = memref.load %arg1[%c0] : memref<1xf32, #tpu.memory_space<smem>>
    %c0_0 = arith.constant 0 : index
    %1 = memref.load %arg2[%c0_0] : memref<1xf32, #tpu.memory_space<smem>>
    %c0_1 = arith.constant 0 : index
    %c0_2 = arith.constant 0 : index
    %2 = vector.load %arg3[%c0_1, %c0_2] : memref<8x256xf32, #tpu.memory_space<vmem>>, vector<8x256xf32>
    %3 = math.tanh %2 : vector<8x256xf32>
    %4 = vector.broadcast %0 : f32 to vector<8x256xf32>
    %5 = arith.mulf %3, %4 : vector<8x256xf32>
    %6 = vector.broadcast %1 : f32 to vector<8x256xf32>
    %7 = arith.addf %5, %6 : vector<8x256xf32>
    %c0_3 = arith.constant 0 : index
    %c0_4 = arith.constant 0 : index
    %8 = vector.load %arg4[%c0_3, %c0_4] : memref<8x256xf32, #tpu.memory_space<vmem>>, vector<8x256xf32>
    tpu.vector_store %arg4[%c0_3, %c0_4], %7 {strides = array<i32>} : memref<8x256xf32, #tpu.memory_space<vmem>>, vector<8x256xf32>,
    return
  }
  func.func @transform_0(%arg0: i32) -> i32 {
    %c0_i32 = arith.constant 0 : i32
    %c0_i32_0 = arith.constant 0 : i32
    return %c0_i32 : i32
  }
  func.func @transform_1(%arg0: i32) -> i32 {
    %c0_i32 = arith.constant 0 : i32
    %c0_i32_0 = arith.constant 0 : i32
    return %c0_i32 : i32
  }
  func.func @transform_2(%arg0: i32) -> (i32, i32) {
    %c0_i32 = arith.constant 0 : i32
    %c0_i32_0 = arith.constant 0 : i32
    return %arg0, %c0_i32 : i32, i32
  }
  func.func @transform_3(%arg0: i32) -> (i32, i32) {
    %c0_i32 = arith.constant 0 : i32
    %c0_i32_0 = arith.constant 0 : i32
    return %arg0, %c0_i32 : i32, i32
  }
}

</mosaic_0001>

<bundles_post_ra>
// kernel: _pallas_apply_elementwise.1
= control target key start
LH: loop header
LB: loop body
LE: loop exit
PB: predicated region body
PF: predicated region fallthrough
CT: control target
= control target key end

     0   :  { %s76_s2 = inlined_call_operand.vmem [shape: f32[8,256], index: 2, kind: input, shape index: {}]   ;;  %s77_s0 = inlined_call_operand.<no memory space> [shape: f32[1], index: 0, kind: input, shape index: {}]   ;;  %s78_s1 = inlined_call_operand.<no memory space> [shape: f32[1], index: 1, kind: input, shape index: {}]   ;;  %s79_s3 = inlined_call_operand.vmem [shape: f32[8,256], index: 3, kind: output, shape index: {}]  }
   0x1   :  { %v18_v0 = vld [vmem:[%s76_s2] sm:$0xff]  ;;  %v19_v1 = vld [vmem:[%s76_s2 + $0x8] sm:$0xff]  ;;  %v22_v2 = vstv %s77_s0  ;;  %v25_v4 = vstv %s78_s1 }
   0x2   :  { %34 = vtanh.f32 %v18_v0 }
   0x3   :  { %36 = vtanh.f32 %v19_v1 }
   0xf   :  { %v35_v3 = vpop.eup %34 }
  0x10   :  { %v37_v5 = vpop.eup %36  ;;  %v23_v6 = vmul.f32 %v35_v3, %v22_v2 }
  0x11   :  { %v24_v7 = vmul.f32 %v37_v5, %v22_v2 }
  0x12   :  { %v26_v8 = vadd.f32 %v25_v4, %v23_v6 }
  0x13   :  { %v27_v9 = vadd.f32 %v25_v4, %v24_v7 }
  0x14   :  { %28 = vst [vmem:[%s79_s3] sm:$0xff] %v26_v8 }
  0x15   :  { %29 = vst [vmem:[%s79_s3 + $0x8] sm:$0xff] %v27_v9 }

</bundles_post_ra>
